<compile_context>
chip_gen: v6e
topology: v6e:2x2x1
jax: 0.10.0
libtpu: 0.0.40
codegen_flags: <defaults>
</compile_context>

<pallas_src>
import jax
import jax.numpy as jnp
from jax.experimental import pallas as pl
from jax.experimental.pallas import tpu as pltpu


_MAX_TILE_COLS = 32768          # hard cap on spatial tile width (lanes)
_MAX_BATCH_BLOCK = 8            # cap on images folded into one grid step
_VMEM_BUDGET = 12 * 1024 * 1024  # double-buffered working set, v5e-safe


def _focus_conv_kernel(x_ref, w_ref, bias_ref, o_ref):
    # x_ref:    (Nb, K, TS)  bf16 activations, spatial on the 128-lane axis
    # w_ref:    (c2, K)      bf16 1x1 conv weight with BN scale folded in
    # bias_ref: (c2, 1)      f32 folded BN bias = beta - mean * gamma / sqrt(var+eps)
    # o_ref:    (Nb, c2, TS)
    w = w_ref[...]
    b = bias_ref[...]
    for i in range(x_ref.shape[0]):            # static, Nb <= _MAX_BATCH_BLOCK
        acc = jnp.dot(w, x_ref[i], preferred_element_type=jnp.float32)
        y = acc + b
        # Hardswish: y * relu6(y + 3) / 6   (Conv.act in yolov4_pytorch common.py)
        o_ref[i] = (y * jnp.clip(y + 3.0, 0.0, 6.0) * (1.0 / 6.0)).astype(o_ref.dtype)


def _largest_divisor_leq(n, cap):
    cap = max(1, min(n, cap))
    for d in range(cap, 0, -1):
        if n % d == 0:
            return d
    return 1


def _plan_tiles(N, S, K, c2, act_bytes, out_bytes):
    """Pick (batch_block, spatial_tile, num_spatial_blocks)."""
    per_col = 2 * (K * act_bytes + c2 * out_bytes)      # double-buffered bytes/column
    cap = (_VMEM_BUDGET // per_col) // 128 * 128
    cap = max(128, min(_MAX_TILE_COLS, cap))

    if S <= cap:
        ts, sb = S, 1                                    # full-S block: always legal
        nb = _largest_divisor_leq(N, min(_MAX_BATCH_BLOCK, max(1, cap // S)))
    else:
        ts = 0
        t = cap
        while t >= 128:                                  # largest 128-multiple divisor
            if S % t == 0:
                ts = t
                break
            t -= 128
        if ts == 0:                                      # no even tiling: masked edge
            ts = cap
        sb = pl.cdiv(S, ts)
        nb = 1

    # Keep >= 2 grid steps on a "parallel" axis when possible (v7x has 2 TCs).
    if (N // nb) * sb < 2:
        if N >= 2:
            nb = _largest_divisor_leq(N, N // 2)
        elif S >= 256:
            ts = max(128, ((S // 2 + 127) // 128) * 128)
            sb = pl.cdiv(S, ts)
    return nb, ts, sb


def focus_forward(x, weight, bn_gamma, bn_beta, bn_mean, bn_var,
                  eps=1e-5, out_dtype=jnp.float32):
    """Focus.forward for k=1, s=1, g=1, act=True (BatchNorm in eval mode).

    x:      (N, c1, H, W)        float32, NCHW (PyTorch convention)
    weight: (c2, 4*c1, 1, 1)     Conv2d weight (bias=False)
    bn_*:   (c2,)                BatchNorm2d params / running stats
    returns (N, c2, H//2, W//2)  NCHW
    """
    N, c1, H, W = x.shape
    assert H % 2 == 0 and W % 2 == 0, "Focus requires even H and W"
    c2 = weight.shape[0]
    Ho, Wo = H // 2, W // 2
    K = 4 * c1
    S = Ho * Wo

    # ---- space-to-depth in torch.cat order, as ONE fused transpose (+ bf16 cast) ----
    # phase index = dx*2 + dy matches cat([::2,::2], [1::2,::2], [::2,1::2], [1::2,1::2])
    x6 = x.reshape(N, c1, Ho, 2, Wo, 2)                    # (n, ch, ho, dy, wo, dx)
    xt = jnp.transpose(x6, (0, 5, 3, 1, 2, 4)).reshape(N, K, S)
    xt = xt.astype(jnp.bfloat16)                           # MXU uses bf16 passes anyway

    # ---- fold BN into the weight (scale) and a per-channel bias ----
    scale = bn_gamma / jnp.sqrt(bn_var + eps)
    w_s = (weight.reshape(c2, K) * scale[:, None]).astype(jnp.bfloat16)   # (c2, K)
    bias = (bn_beta - bn_mean * scale).astype(jnp.float32).reshape(c2, 1)

    out_bytes = jnp.dtype(out_dtype).itemsize
    nb, ts, sb = _plan_tiles(N, S, K, c2, act_bytes=2, out_bytes=out_bytes)
    grid = (N // nb, sb)

    out = pl.pallas_call(
        _focus_conv_kernel,
        out_shape=jax.ShapeDtypeStruct((N, c2, S), out_dtype),
        grid_spec=pltpu.PrefetchScalarGridSpec(
            num_scalar_prefetch=0,
            grid=grid,
            in_specs=[
                pl.BlockSpec((nb, K, ts), lambda b, j: (b, 0, j)),  # activations
                pl.BlockSpec((c2, K), lambda b, j: (0, 0)),         # folded weight
                pl.BlockSpec((c2, 1), lambda b, j: (0, 0)),         # folded bias
            ],
            out_specs=pl.BlockSpec((nb, c2, ts), lambda b, j: (b, 0, j)),
        ),
        compiler_params=pltpu.CompilerParams(
            dimension_semantics=("parallel", "parallel")),
        cost_estimate=pl.CostEstimate(
            flops=2 * N * S * K * c2,
            transcendentals=0,
            bytes_accessed=(2 * N * K * S + out_bytes * N * c2 * S
                            + 2 * c2 * K + 4 * c2)),
    )(xt, w_s, bias)

    return out.reshape(N, c2, Ho, Wo)                      # already NCHW


def _focus_reference(x, weight, bn_gamma, bn_beta, bn_mean, bn_var, eps=1e-5):
    """Plain-JAX reference matching the PyTorch Focus forward (eval mode)."""
    a = x[:, :, 0::2, 0::2]
    b = x[:, :, 1::2, 0::2]
    c = x[:, :, 0::2, 1::2]
    d = x[:, :, 1::2, 1::2]
    xf = jnp.concatenate([a, b, c, d], axis=1)             # (N, 4c1, Ho, Wo)
    c2 = weight.shape[0]
    w = weight.reshape(c2, -1)
    y = jnp.einsum('nkhw,ck->nchw', xf, w)
    scale = bn_gamma / jnp.sqrt(bn_var + eps)
    bias = bn_beta - bn_mean * scale
    y = y * scale[None, :, None, None] + bias[None, :, None, None]
    return y * jnp.clip(y + 3.0, 0.0, 6.0) / 6.0


if __name__ == "__main__":
    # small shapes consistent with Focus(c1=4, c2=32, k=1, s=1)
    N, c1, H, W = 2, 4, 16, 16
    c2 = 32

    key = jax.random.PRNGKey(0)
    kx, kw, kg, kb, km, kv = jax.random.split(key, 6)

    x = jax.random.normal(kx, (N, c1, H, W), dtype=jnp.float32)

    # deterministic synthetic parameters (Conv2d bias=False, BatchNorm2d eval stats)
    weight = 0.1 * jax.random.normal(kw, (c2, 4 * c1, 1, 1), dtype=jnp.float32)
    bn_gamma = 1.0 + 0.05 * jax.random.normal(kg, (c2,), dtype=jnp.float32)
    bn_beta = 0.05 * jax.random.normal(kb, (c2,), dtype=jnp.float32)
    bn_mean = 0.05 * jax.random.normal(km, (c2,), dtype=jnp.float32)
    bn_var = jnp.abs(1.0 + 0.05 * jax.random.normal(kv, (c2,), dtype=jnp.float32))

    y = focus_forward(x, weight, bn_gamma, bn_beta, bn_mean, bn_var)
    y = jax.block_until_ready(y)

    assert y.shape == (N, c2, H // 2, W // 2), y.shape

    y_ref = _focus_reference(x, weight, bn_gamma, bn_beta, bn_mean, bn_var)
    max_err = float(jnp.max(jnp.abs(y - y_ref)))
    # loose tolerance: activations/weights stream in bf16, matching the MXU's
    # default-precision bf16 passes for f32 matmuls
    assert max_err < 5e-2, f"max abs error vs reference: {max_err}"

    print("KERNEL_OK")
</pallas_src>

<mosaic_0001>
module attributes {stable_mosaic.version = 11 : i64} {
  func.func @_focus_conv_kernel(%arg0: i32, %arg1: i32, %arg2: memref<1x16x64xbf16, #tpu.memory_space<vmem>>, %arg3: memref<32x16xbf16, #tpu.memory_space<vmem>>, %arg4: memref<32x1xf32, #tpu.memory_space<vmem>>, %arg5: memref<1x32x64xf32, #tpu.memory_space<vmem>>) attributes {dimension_semantics = [#tpu.dimension_semantics<parallel>, #tpu.dimension_semantics<parallel>], iteration_bounds = array<i64: 2, 1>, scalar_prefetch = 0 : i64, scratch_operands = 0 : i64, tpu.core_type = #tpu.core_type<tc>, window_params = [{transform_indices = @transform_0, window_bounds = array<i64: 1, 16, 64>}, {pipeline_mode = #tpu.pipeline_mode<synchronous>, transform_indices = @transform_1, window_bounds = array<i64: 32, 16>}, {pipeline_mode = #tpu.pipeline_mode<synchronous>, transform_indices = @transform_2, window_bounds = array<i64: 32, 1>}, {transform_indices = @transform_3, window_bounds = array<i64: 1, 32, 64>}]} {
    %c0 = arith.constant 0 : index
    %c0_0 = arith.constant 0 : index
    %0 = vector.load %arg3[%c0, %c0_0] : memref<32x16xbf16, #tpu.memory_space<vmem>>, vector<32x16xbf16>
    %c0_1 = arith.constant 0 : index
    %c0_2 = arith.constant 0 : index
    %1 = vector.load %arg4[%c0_1, %c0_2] : memref<32x1xf32, #tpu.memory_space<vmem>>, vector<32x1xf32>
    %c0_3 = arith.constant 0 : index
    %c0_4 = arith.constant 0 : index
    %c0_5 = arith.constant 0 : index
    %2 = vector.load %arg2[%c0_3, %c0_4, %c0_5] : memref<1x16x64xbf16, #tpu.memory_space<vmem>>, vector<1x16x64xbf16>
    %3 = vector.shape_cast %2 : vector<1x16x64xbf16> to vector<16x64xbf16>
    %cst = arith.constant dense<0.000000e+00> : vector<32x64xf32>
    %4 = tpu.matmul %0, %3, %cst {dimension_numbers = #tpu.dot_dimension_numbers<[1], [0], [0], [1], [0, 0, 1, 1], [], []>} : vector<32x16xbf16>, vector<16x64xbf16>, vector<32x64xf32> -> vector<32x64xf32>
    %5 = vector.broadcast %1 : vector<32x1xf32> to vector<32x64xf32>
    %6 = arith.addf %4, %5 : vector<32x64xf32>
    %cst_6 = arith.constant 3.000000e+00 : f32
    %7 = vector.broadcast %cst_6 : f32 to vector<32x64xf32>
    %8 = arith.addf %6, %7 : vector<32x64xf32>
    %cst_7 = arith.constant 0.000000e+00 : f32
    %cst_8 = arith.constant 6.000000e+00 : f32
    %9 = vector.broadcast %cst_7 : f32 to vector<32x64xf32>
    %10 = arith.maximumf %9, %8 : vector<32x64xf32>
    %11 = vector.broadcast %cst_8 : f32 to vector<32x64xf32>
    %12 = arith.minimumf %11, %10 : vector<32x64xf32>
    %13 = arith.mulf %6, %12 : vector<32x64xf32>
    %cst_9 = arith.constant 0.166666672 : f32
    %14 = vector.broadcast %cst_9 : f32 to vector<32x64xf32>
    %15 = arith.mulf %13, %14 : vector<32x64xf32>
    %c0_10 = arith.constant 0 : index
    %c0_11 = arith.constant 0 : index
    %c0_12 = arith.constant 0 : index
    %16 = vector.load %arg5[%c0_10, %c0_11, %c0_12] : memref<1x32x64xf32, #tpu.memory_space<vmem>>, vector<1x32x64xf32>
    %17 = vector.shape_cast %16 : vector<1x32x64xf32> to vector<32x64xf32>
    %18 = vector.shape_cast %15 : vector<32x64xf32> to vector<1x32x64xf32>
    tpu.vector_store %arg5[%c0_10, %c0_11, %c0_12], %18 {strides = array<i32>} : memref<1x32x64xf32, #tpu.memory_space<vmem>>, vector<1x32x64xf32>,
    return
  }
  func.func @transform_0(%arg0: i32, %arg1: i32) -> (i32, i32, i32) {
    %c0_i32 = arith.constant 0 : i32
    %c0_i32_0 = arith.constant 0 : i32
    return %arg0, %c0_i32, %arg1 : i32, i32, i32
  }
  func.func @transform_1(%arg0: i32, %arg1: i32) -> (i32, i32) {
    %c0_i32 = arith.constant 0 : i32
    %c0_i32_0 = arith.constant 0 : i32
    %c0_i32_1 = arith.constant 0 : i32
    return %c0_i32, %c0_i32_0 : i32, i32
  }
  func.func @transform_2(%arg0: i32, %arg1: i32) -> (i32, i32) {
    %c0_i32 = arith.constant 0 : i32
    %c0_i32_0 = arith.constant 0 : i32
    %c0_i32_1 = arith.constant 0 : i32
    return %c0_i32, %c0_i32_0 : i32, i32
  }
  func.func @transform_3(%arg0: i32, %arg1: i32) -> (i32, i32, i32) {
    %c0_i32 = arith.constant 0 : i32
    %c0_i32_0 = arith.constant 0 : i32
    return %arg0, %c0_i32, %arg1 : i32, i32, i32
  }
}

</mosaic_0001>

<bundles_post_ra>
// kernel: tpu_custom_call.1
= control target key start
LH: loop header
LB: loop body
LE: loop exit
PB: predicated region body
PF: predicated region fallthrough
CT: control target
= control target key end

     0   :  { %8 = vsyncpa [#allocation3], 0  ;;  %s751_s0 = inlined_call_operand.vmem [shape: bf16[2,16,64], index: 0, kind: input, shape index: {}]   ;;  %s752_s1 = inlined_call_operand.vmem [shape: bf16[32,16], index: 1, kind: input, shape index: {}]   ;;  %s753_s2 = inlined_call_operand.vmem [shape: f32[32,1], index: 2, kind: input, shape index: {}]   ;;  %s754_s3 = inlined_call_operand.hbm [shape: f32[2,32,64], index: 3, kind: output, shape index: {}]  }
   0x1   :  { %10 = vsyncpa [#allocation3 + $0x1], 0  ;;  %s609_s12 = smov 0   ;;  %s611_s13 = smov 0  }
   0x2   :  { %s613_s14 = smov 0   ;;  %s615_s15 = smov 0  }
   0x3   :  { %s617_s16 = smov 0   ;;  %s619_s17 = smov 0  }
   0x4 LB: > { %s415_s18 = sadd.s32 4294967295, %s583_s17   ;;  %s416_s19 = sadd.s32 4294967294, %s583_s17   ;;  %s583_s17 = sphi %s619_s17, %s16_s17   ;;  %s579_s16 = sphi %s617_s16, %s761_s16   ;;  %s575_s15 = sphi %s615_s15, %s760_s15   ;;  %s571_s14 = sphi %s613_s14, %s759_s14   ;;  %s567_s13 = sphi %s611_s13, %s758_s13   ;;  %s563_s12 = sphi %s609_s12, %s757_s12  }
   0x5   : > { %s28_s20 = sadd.s32 1, %s579_s16  ;;  %s107_s21 = sadd.s32 1, %s571_s14 }
   0x6   : > { %p30_p0 = scmp.ge.s32.totalorder %s28_s20, 2  ;;  %p117_p1 = scmp.ne.s32.totalorder %s571_s14, %s567_s13 }
   0x7   : > { %p118_p2 = scmp.eq.s32.totalorder %s415_s18, 1  ;;  %p123_p3 = scmp.ne.s32.totalorder %s567_s13, %s563_s12 }
   0x8   : > { %s763_s20 = smov (%p30_p0, %s28_s20), 0  ;;  %p124_p5 = scmp.eq.s32.totalorder %s416_s19, 1 }
   0x9   : > { %p649_p4 = por %p118_p2, %p117_p1  ;;  %s102_s23 = ssub.s32 %s579_s16, %s763_s20 }
   0xa   : > { %p419_p6 = scmp.ge.s32.totalorder %s583_s17, 1  ;;  %p105_p7 = scmp.eq.s32.totalorder %s102_s23, 0 }
   0xb   : > { %p656_p8 = por %p124_p5, %p123_p3  ;;  %p159_p9 = scmp.lt.s32.totalorder %s583_s17, 3 }
   0xc   : > { %s662_s25 = scalar_select %p105_p7, %s571_s14, %s107_s21  }
   0xd   : > { %p160_p10 = pnand %p419_p6, %p159_p9 }
   0xe   : > { %p186_p11 = scmp.lt.s32.totalorder (!%p160_p10), %s575_s15, 1  ;;  %s183_s26 = sand.u32 (!%p160_p10), 1, %s567_s13  }
   0xf   : > { %163 = sbr.rel (%p160_p10) target bundleno = 254 (0xfe), region = 32  ;;  %s420_s27 = sshll.u32 (!%p160_p10), %s183_s26, 5 }
  0x10   : > { %s434_s29 = sshll.u32 (!%p160_p10), %s575_s15, 9  ;;  %s586_s8 = smov (!%p160_p10), [#allocation2]  }
  0x14   : > { %v505_v0 = vld [vmem:[%s752_s1] sm:$0xff]   ;;  %vm241_vm0 = vcmask 130048   ;;  %s187_s28 = scalar_select %p186_p11, %s575_s15, 1  ;;  %v201_v1 = vld [vmem:[%s753_s2 + $0x10] sm:$0xff]  ;;  %v585_v3 = vmov 0   ;;  %v202_v4 = vld [vmem:[%s753_s2 + $0x18] sm:$0xff] }
  0x15   : > { %440 = vmatprep.mubr.msk.bf16.mxu0 %vm241_vm0, %v505_v0  ;;  %v199_v2 = vld [vmem:[%s753_s2] sm:$0xff]  ;;  %503 = vset.pattern.permute.xlu1 %v585_v3  ;;  %v200_v5 = vld [vmem:[%s753_s2 + $0x8] sm:$0xff]  ;;  %vm317_vm1 = vcmask 523264   ;;  %s706_s15 = scalar_lea.sflag [#allocation3], %s183_s26 }
  0x16   : > { %502 = vset.pattern.permute.xlu0 %v585_v3  ;;  %s433_s6 = sshll.u32 %s187_s28, 3  ;;  %217 = vperm.xlu1 %503, %v201_v1   ;;  %v506_v7 = vld [vmem:[%s752_s1 + $0x8] sm:$0xff]   ;;  %s185_s28 = scalar_lea.vmem [#allocation2], %s420_s27 }
  0x17   : > { %207 = vperm.xlu0 %502, %v199_v2   ;;  %s193_s9 = scalar_lea.vmem %s751_s0, %s433_s6  ;;  %s337_s30 = sshll.u32 %s185_s28, 4  ;;  %s700_s30 = int_to_ptr.vmem [resolvable:$true] %s337_s30 }
  0x18   : > { %v504_v6 = vld [vmem:[%s193_s9] sm:$0xff]   ;;  %s698_s6 = scalar_lea.hbm %s754_s3, %s434_s29  ;;  %s507_s7 = scalar_lea.vmem %s700_s30, 512 }
  0x19   : > { %438 = vmatprep.subr.bf16.mxu0 %v504_v6  ;;  %p508_p12 = scmp.ne.s32.totalorder %s700_s30, %s507_s7  ;;  %s511_s9 = sshll.u32 %s586_s8, 4  ;;  %s512_s9 = int_to_ptr.vmem [resolvable:$false] %s511_s9 }
  0x1a   : > { %222 = vperm.xlu1 %503, %v202_v4   ;;  %439 = vmatpush3.bf16.msra.mxu0 %v504_v6  ;;  %s513_s10 = scalar_lea.vmem %s512_s9, 1024  ;;  %p514_p1 = scmp.lt.s32.totalorder %s700_s30, %s512_s9 }
  0x1b   : > { %212 = vperm.xlu0 %502, %v200_v5   ;;  %p509_p13 = pnand %p508_p12, %p649_p4  ;;  %p515_p2 = scmp.lt.s32.totalorder %s513_s10, %s507_s7 }
  0x1d   : > { %441 = vmatmul.mubr.msk.bf16.vlgmr.msra.gmra.mxu0 %vm241_vm0, %v506_v7  ;;  %p510_p0 = pneg %p509_p13  ;;  %p516_p3 = por %p515_p2, %p514_p1 }
  0x1f   : > { %p517_p5 = pnand %p516_p3, %p510_p0 }
  0x91   : > { %v218_v8 = vpop.permute.xlu1 %217 }
  0x92   : > { %v208_v9 = vpop.permute.xlu0 %207 }
  0x95   : > { %v223_v15 = vpop.permute.xlu1 %222 }
  0x96   : > { %v213_v20 = vpop.permute.xlu0 %212 }
  0xdd   : > { %v442_v10 = vpop.f32.mrf.mxu0 }
  0xde   : > { %v291_v11 = vadd.f32 %v442_v10, %v218_v8 }
  0xdf   : > { %v282_v12 = vpop.f32.mrf.mxu0 }
  0xe0   : > { %v299_v13 = vadd.f32 3.0, %v291_v11  ;;  %v283_v14 = vadd.f32 %v282_v12, %v208_v9 }
  0xe1   : > { %v443_v16 = vpop.f32.mrf.mxu0 }
  0xe2   : > { %v303_v17 = vmax.f32 %v299_v13, 0.0  ;;  %v297_v18 = vadd.f32 3.0, %v283_v14  ;;  %v294_v19 = vadd.f32 %v443_v16, %v223_v15 }
  0xe3   : > { %v285_v21 = vpop.f32.mrf.mxu0 }
  0xe4   : > { %v307_v22 = vmin.f32 %v303_v17, 6.0  ;;  %v301_v23 = vmax.f32 %v297_v18, 0.0  ;;  %v300_v24 = vadd.f32 3.0, %v294_v19  ;;  %v286_v25 = vadd.f32 %v285_v21, %v213_v20 }
  0xe6   : > { %v311_v26 = vmul.f32 %v307_v22, %v291_v11  ;;  %v305_v27 = vmin.f32 %v301_v23, 6.0  ;;  %v304_v28 = vmax.f32 %v300_v24, 0.0  ;;  %v298_v29 = vadd.f32 3.0, %v286_v25 }
  0xe8   : > { %v315_v30 = vmul.f32 0.16666667, %v311_v26  ;;  %v309_v31 = vmul.f32 %v305_v27, %v283_v14  ;;  %v308_v32 = vmin.f32 %v304_v28, 6.0  ;;  %v302_v33 = vmax.f32 %v298_v29, 0.0 }
  0xea   : > { %320 = vst.msk [vmem:[%s185_s28 + $0x10] sm:$0xff] %vm317_vm1, %v315_v30  ;;  %v313_v34 = vmul.f32 0.16666667, %v309_v31  ;;  %v312_v35 = vmul.f32 %v308_v32, %v294_v19  ;;  %v306_v36 = vmin.f32 %v302_v33, 6.0 }
  0xec   : > { %318 = vst.msk [vmem:[%s185_s28] sm:$0xff] %vm317_vm1, %v313_v34  ;;  %v316_v37 = vmul.f32 0.16666667, %v312_v35  ;;  %v310_v38 = vmul.f32 %v306_v36, %v286_v25 }
  0xee   : > { %321 = vst.msk [vmem:[%s185_s28 + $0x18] sm:$0xff] %vm317_vm1, %v316_v37  ;;  %v314_v39 = vmul.f32 0.16666667, %v310_v38 }
  0xf0   : > { %319 = vst.msk [vmem:[%s185_s28 + $0x8] sm:$0xff] %vm317_vm1, %v314_v39 }
  0xf1   : > { %520 = shalt.err (!%p517_p5)
}
  0xf2   : > { %s521_s11 = scalar_lea.hbm %s698_s6, 512  ;;  %s525_s21 = scalar_lea.hbm %s754_s3, 1024 }
  0xf3   : > { %p522_p6 = scmp.ne.s32.totalorder %s698_s6, %s521_s11  ;;  %p526_p10 = scmp.lt.s32.totalorder %s698_s6, %s754_s3 }
  0xf4   : > { %p527_p11 = scmp.lt.s32.totalorder %s525_s21, %s521_s11 }
  0xf5   : > { %p523_p7 = pnand %p522_p6, %p649_p4 }
  0xf6   : > { %p528_p12 = por %p527_p11, %p526_p10 }
  0xf7   : > { %p524_p9 = pneg %p523_p7 }
  0xf9   : > { %p529_p13 = pnand %p528_p12, %p524_p9 }
  0xfb   : > { %532 = shalt.err (!%p529_p13)
}
  0xfc   : > { %s587_s27 = smov 128   ;;  %s588_s28 = smov 8  }
  0xfd   : > { %444 = dma.vmem_to_hbm [thread:$0]  (%p649_p4), %s700_s30, 512, %s698_s6, %s706_s15, %s587_s27, %s587_s27, %s588_s28  }
  0xfe PF: > { %p450_p0 = scmp.ge.s32.totalorder %s583_s17, 2  ;;  %s352_s29 = sand.u32 1, %s563_s12  }
  0xff   : > { %s353_s4 = scalar_lea.sflag [#allocation3], %s352_s29 }
 0x100   : > { %p447_p1 = pnand %p450_p0, %p656_p8 }
 0x102   : > { %p448_p2 = pneg %p447_p1 }
 0x104   : > { %558 = dma.done.wait (%p448_p2), %s353_s4, 512  }
 0x105   : > { %560 = vsyncadd (%p448_p2), %s353_s4, 4294966784  ;;  %s16_s17 = sadd.s32 1, %s583_s17   ;;  %s757_s12 = smov %s567_s13 }
 0x106   : > { %p13_p3 = scmp.ge.s32.totalorder %s16_s17, 4   ;;  %s758_s13 = smov %s571_s14 }
 0x107   : > { %s759_s14 = smov %s662_s25  ;;  %s760_s15 = smov %s579_s16 }
 0x108   : > { %s761_s16 = smov %s763_s20  ;;  %15 = sbr.rel (!%p13_p3) target bundleno = 4 (0x4), region = 67 }
 0x10d   :  { %358 = vsyncpa [#allocation3], 1 }
 0x10e   :  { %360 = vsyncpa [#allocation3 + $0x1], 1 }

</bundles_post_ra>
